<compile_context>
chip_gen: v7x
topology: tpu7x:2x2x1
jax: 0.10.0
libtpu: 0.0.40
codegen_flags: <defaults>
</compile_context>

<pallas_src>
import jax
import jax.numpy as jnp
from jax.experimental import pallas as pl
from jax.experimental.pallas import tpu as pltpu

_LANE = 128
_SUBLANE = 8


def _round_up(x, m):
    return -(-x // m) * m


def _make_kernel(b, p, rows_tile, num_tiles, tiles_per_slice, needs_mask):
    def kernel(pred_ref, target_ref, s0_ref, s1_ref, t_ref):
        c = pl.program_id(0)            # parallel slice (TensorCore on v7x)
        k = pl.program_id(1)            # reduction over row-tiles
        tile_idx = c * tiles_per_slice + k

        @pl.when(k == 0)
        def _init():
            s0_ref[...] = jnp.zeros_like(s0_ref)
            s1_ref[...] = jnp.zeros_like(s1_ref)
            t_ref[...] = jnp.zeros_like(t_ref)

        # Inputs stream in native dtype; cast to fp32 in-register.
        x = pred_ref[...].astype(jnp.float32)      # (B, rows_tile, 128)
        t = target_ref[...].astype(jnp.float32)
        pos = t > 0.0
        # log(sigmoid(x)) if t > 0 else log(1 - sigmoid(x)) == log_sigmoid(+-x)
        log_term = jax.nn.log_sigmoid(jnp.where(pos, x, -x))
        log_pos = jnp.where(pos, log_term, 0.0)

        def accumulate(lt, ltp, tt):
            # Reduce the sublane axis per tile; keep lane-dense (B,128)
            # partials resident in the output block (final lane reduce is
            # done once in the wrapper).
            s0_ref[...] += jnp.sum(lt, axis=1)[None]
            s1_ref[...] += jnp.sum(ltp, axis=1)[None]
            t_ref[...] += jnp.sum(tt, axis=1)[None]

        if needs_mask:
            last = num_tiles - 1

            @pl.when(tile_idx < last)
            def _steady():                       # fully valid tiles: no mask
                accumulate(log_term, log_pos, t)

            @pl.when(tile_idx == last)
            def _tail():                         # mask pad lanes / stale rows
                row = jax.lax.broadcasted_iota(jnp.int32, x.shape, 1)
                lane = jax.lax.broadcasted_iota(jnp.int32, x.shape, 2)
                flat = (last * rows_tile + row) * _LANE + lane
                valid = flat < p
                accumulate(jnp.where(valid, log_term, 0.0),
                           jnp.where(valid, log_pos, 0.0),
                           jnp.where(valid, t, 0.0))
            # tile_idx >= num_tiles (duplicated grid slot when the tile count
            # is odd on the 2-way split) falls through both branches -> 0.
        else:
            accumulate(log_term, log_pos, t)

    return kernel


def wtd_bce_loss(pred, target, *, rows_tile_cap=None):
    """pred, target: same shape, at least 2-D (e.g. NCHW). Returns scalar fp32."""
    assert pred.shape == target.shape, "Different size of pred and target"
    b = pred.shape[0]
    p = 1
    for d in pred.shape[1:]:
        p *= d

    pred_f = pred.reshape(b, p)
    target_f = target.reshape(b, p)
    itemsize = max(pred_f.dtype.itemsize, target_f.dtype.itemsize)

    # ---- (B, P) -> (B, R, 128): full-sublane packing independent of B. ----
    p128 = _round_up(p, _LANE)
    if p128 != p:
        # Minimal pad (<128 lanes) so the 3-D reshape is legal; padded lanes
        # are masked in-kernel.  (Only this case pays one extra slab copy.)
        pred_f = jnp.pad(pred_f, ((0, 0), (0, p128 - p)))
        target_f = jnp.pad(target_f, ((0, 0), (0, p128 - p)))
    r = p128 // _LANE
    pred_r = pred_f.reshape(b, r, _LANE)
    target_r = target_f.reshape(b, r, _LANE)

    # ---- Tile sizing from the actual generation's VMEM capacity. ----------
    try:
        vmem_cap = int(pltpu.get_tpu_info().vmem_capacity_bytes)
    except Exception:
        vmem_cap = 64 << 20                       # conservative (v7x per-core)
    vmem_limit = int(min((3 * vmem_cap) // 4, 96 << 20))
    budget = (3 * vmem_limit) // 5                # headroom for pipeline etc.
    # Resident bytes per 128-lane row-group per grid step:
    #   2 inputs x 2 pipeline buffers (native dtype) + ~6 fp32 temporaries.
    per_row_bytes = b * _LANE * (4 * itemsize + 6 * 4)
    rows_by_vmem = max(_SUBLANE, budget // per_row_bytes)
    rows_by_dma = max(_SUBLANE, (4 << 20) // (b * _LANE * itemsize))  # <=4MiB/blk
    rows_tile = min(rows_by_vmem, rows_by_dma, _round_up(r, _SUBLANE))
    if rows_tile_cap is not None:
        rows_tile = min(rows_tile, int(rows_tile_cap))
    rows_tile = max(_SUBLANE, (rows_tile // _SUBLANE) * _SUBLANE)

    num_tiles = -(-r // rows_tile)
    num_slices = min(2, num_tiles)     # 2 TensorCores on v7x; harmless on 1-TC
    tiles_per_slice = -(-num_tiles // num_slices)
    total_slots = num_slices * tiles_per_slice
    needs_mask = (p128 != p) or (num_tiles * rows_tile != r) \
        or (total_slots != num_tiles)

    def in_map(c, k):
        # Clamp so a duplicated grid slot (odd tile count on the 2-way split)
        # re-reads the last valid block instead of going out of bounds; the
        # kernel skips its accumulation.
        idx = jnp.minimum(c * tiles_per_slice + k, num_tiles - 1)
        return (0, idx, 0)

    kernel = _make_kernel(b, p, rows_tile, num_tiles, tiles_per_slice,
                          needs_mask)

    out_sds = jax.ShapeDtypeStruct((num_slices, b, _LANE), jnp.float32)
    cost = pl.CostEstimate(
        flops=10 * b * p,
        transcendentals=2 * b * p,
        bytes_accessed=2 * b * p * itemsize + 3 * num_slices * b * _LANE * 4,
    )

    s0, s1, tsum = pl.pallas_call(
        kernel,
        out_shape=(out_sds, out_sds, out_sds),
        grid=(num_slices, tiles_per_slice),
        in_specs=[
            pl.BlockSpec((b, rows_tile, _LANE), in_map),
            pl.BlockSpec((b, rows_tile, _LANE), in_map),
        ],
        out_specs=(
            pl.BlockSpec((1, b, _LANE), lambda c, k: (c, 0, 0)),
            pl.BlockSpec((1, b, _LANE), lambda c, k: (c, 0, 0)),
            pl.BlockSpec((1, b, _LANE), lambda c, k: (c, 0, 0)),
        ),
        compiler_params=pltpu.CompilerParams(
            dimension_semantics=("parallel", "arbitrary"),
            vmem_limit_bytes=vmem_limit,
        ),
        cost_estimate=cost,
    )(pred_r, target_r)

    # Tiny partial combine (at most 2 x B x 128 x 3 fp32 values); XLA fuses it.
    s0_row = jnp.sum(s0, axis=(0, 2))            # (B,)
    s1_row = jnp.sum(s1, axis=(0, 2))
    t_row = jnp.sum(tsum, axis=(0, 2))
    beta = t_row / float(p)                      # true P, not the padded one
    per_row = beta * s0_row + (1.0 - 2.0 * beta) * s1_row
    return -jnp.sum(per_row) / float(b)


def _reference_loss(pred, target):
    # Faithful port of the PyTorch module (sigmoid -> log, matmul beta).
    b = pred.shape[0]
    p_flat = jax.nn.sigmoid(pred.reshape(b, -1).astype(jnp.float32))
    t_flat = target.reshape(b, -1).astype(jnp.float32)
    pred_2 = jnp.log(jnp.where(t_flat > 0, p_flat, 1.0 - p_flat))
    p = t_flat.shape[1]
    beta = jnp.broadcast_to(t_flat @ (jnp.ones((p, 1), jnp.float32) / p), (b, p))
    target_2 = jnp.where(t_flat > 0, 1.0 - beta, beta)
    return -jnp.sum(pred_2 * target_2) / b


if __name__ == "__main__":
    key = jax.random.PRNGKey(0)
    k1, k2, k3, k4 = jax.random.split(key, 4)

    # NCHW, P = 4*16*16 = 1024 (lane-aligned -> single unmasked tile).
    B, C, H, W = 2, 4, 16, 16
    pred = jax.random.normal(k1, (B, C, H, W), dtype=jnp.float32)
    target = (jax.random.uniform(k2, (B, C, H, W)) > 0.7).astype(jnp.float32)
    loss = wtd_bce_loss(pred, target)
    jax.block_until_ready(loss)
    ref = _reference_loss(pred, target)
    assert jnp.allclose(loss, ref, rtol=1e-4, atol=1e-4), (loss, ref)

    # P = 3*32*22 = 2112 (not lane-aligned) with a forced tiny tile: exercises
    # the lane-pad mask, the partial last rows-block, and an odd tile count
    # (duplicated grid slot on the 2-way parallel split).
    B2, C2, H2, W2 = 2, 3, 32, 22
    pred_b = jax.random.normal(k3, (B2, C2, H2, W2), dtype=jnp.float32)
    target_b = (jax.random.uniform(k4, (B2, C2, H2, W2)) > 0.7).astype(jnp.float32)
    loss_b = wtd_bce_loss(pred_b, target_b, rows_tile_cap=8)
    jax.block_until_ready(loss_b)
    ref_b = _reference_loss(pred_b, target_b)
    assert jnp.allclose(loss_b, ref_b, rtol=1e-4, atol=1e-4), (loss_b, ref_b)

    print("KERNEL_OK")
</pallas_src>

<mosaic_0001>
module attributes {stable_mosaic.version = 11 : i64} {
  func.func @kernel(%arg0: i32, %arg1: i32, %arg2: memref<2x8x128xf32, #tpu.memory_space<vmem>>, %arg3: memref<2x8x128xf32, #tpu.memory_space<vmem>>, %arg4: memref<1x2x128xf32, #tpu.memory_space<vmem>>, %arg5: memref<1x2x128xf32, #tpu.memory_space<vmem>>, %arg6: memref<1x2x128xf32, #tpu.memory_space<vmem>>) attributes {dimension_semantics = [#tpu.dimension_semantics<parallel>, #tpu.dimension_semantics<arbitrary>], iteration_bounds = array<i64: 1, 1>, scalar_prefetch = 0 : i64, scratch_operands = 0 : i64, tpu.core_type = #tpu.core_type<tc>, window_params = [{transform_indices = @transform_0, window_bounds = array<i64: 2, 8, 128>}, {transform_indices = @transform_1, window_bounds = array<i64: 2, 8, 128>}, {transform_indices = @transform_2, window_bounds = array<i64: 1, 2, 128>}, {transform_indices = @transform_3, window_bounds = array<i64: 1, 2, 128>}, {transform_indices = @transform_4, window_bounds = array<i64: 1, 2, 128>}]} {
    %c0_i32 = arith.constant 0 : i32
    %0 = arith.cmpi eq, %arg1, %c0_i32 : i32
    %1 = arith.extui %0 : i1 to i32
    %c0_i32_0 = arith.constant 0 : i32
    %2 = arith.cmpi ne, %1, %c0_i32_0 : i32
    scf.if %2 {
      %cst_33 = arith.constant 0.000000e+00 : f32
      %45 = vector.broadcast %cst_33 : f32 to vector<1x2x128xf32>
      %c0_34 = arith.constant 0 : index
      %c0_35 = arith.constant 0 : index
      %c0_36 = arith.constant 0 : index
      %46 = vector.load %arg4[%c0_34, %c0_35, %c0_36] : memref<1x2x128xf32, #tpu.memory_space<vmem>>, vector<1x2x128xf32>
      tpu.vector_store %arg4[%c0_34, %c0_35, %c0_36], %45 {strides = array<i32>} : memref<1x2x128xf32, #tpu.memory_space<vmem>>, vector<1x2x128xf32>,
      %cst_37 = arith.constant 0.000000e+00 : f32
      %47 = vector.broadcast %cst_37 : f32 to vector<1x2x128xf32>
      %c0_38 = arith.constant 0 : index
      %c0_39 = arith.constant 0 : index
      %c0_40 = arith.constant 0 : index
      %48 = vector.load %arg5[%c0_38, %c0_39, %c0_40] : memref<1x2x128xf32, #tpu.memory_space<vmem>>, vector<1x2x128xf32>
      tpu.vector_store %arg5[%c0_38, %c0_39, %c0_40], %47 {strides = array<i32>} : memref<1x2x128xf32, #tpu.memory_space<vmem>>, vector<1x2x128xf32>,
      %cst_41 = arith.constant 0.000000e+00 : f32
      %49 = vector.broadcast %cst_41 : f32 to vector<1x2x128xf32>
      %c0_42 = arith.constant 0 : index
      %c0_43 = arith.constant 0 : index
      %c0_44 = arith.constant 0 : index
      %50 = vector.load %arg6[%c0_42, %c0_43, %c0_44] : memref<1x2x128xf32, #tpu.memory_space<vmem>>, vector<1x2x128xf32>
      tpu.vector_store %arg6[%c0_42, %c0_43, %c0_44], %49 {strides = array<i32>} : memref<1x2x128xf32, #tpu.memory_space<vmem>>, vector<1x2x128xf32>,
    } else {
    }
    %c0 = arith.constant 0 : index
    %c0_1 = arith.constant 0 : index
    %c0_2 = arith.constant 0 : index
    %3 = vector.load %arg2[%c0, %c0_1, %c0_2] : memref<2x8x128xf32, #tpu.memory_space<vmem>>, vector<2x8x128xf32>
    %c0_3 = arith.constant 0 : index
    %c0_4 = arith.constant 0 : index
    %c0_5 = arith.constant 0 : index
    %4 = vector.load %arg3[%c0_3, %c0_4, %c0_5] : memref<2x8x128xf32, #tpu.memory_space<vmem>>, vector<2x8x128xf32>
    %cst = arith.constant 0.000000e+00 : f32
    %5 = vector.broadcast %cst : f32 to vector<2x8x128xf32>
    %6 = arith.cmpf ogt, %4, %5 : vector<2x8x128xf32>
    %cst_6 = arith.constant 0.000000e+00 : f32
    %7 = vector.broadcast %cst_6 : f32 to vector<2x8x128xf32>
    %8 = arith.subf %7, %3 : vector<2x8x128xf32>
    %9 = arith.select %6, %3, %8 : vector<2x8x128xi1>, vector<2x8x128xf32>
    %cst_7 = arith.constant 0.000000e+00 : f32
    %10 = vector.broadcast %cst_7 : f32 to vector<2x8x128xf32>
    %11 = arith.subf %10, %9 : vector<2x8x128xf32>
    %cst_8 = arith.constant 0.000000e+00 : f32
    %12 = vector.broadcast %cst_8 : f32 to vector<2x8x128xf32>
    %13 = arith.maximumf %11, %12 : vector<2x8x128xf32>
    %14 = vector.broadcast %cst_8 : f32 to vector<2x8x128xf32>
    %15 = arith.subf %11, %14 : vector<2x8x128xf32>
    %16 = arith.cmpf one, %15, %15 : vector<2x8x128xf32>
    %17 = vector.broadcast %cst_8 : f32 to vector<2x8x128xf32>
    %18 = arith.addf %11, %17 : vector<2x8x128xf32>
    %19 = math.absf %15 : vector<2x8x128xf32>
    %cst_9 = arith.constant 0.000000e+00 : f32
    %20 = vector.broadcast %cst_9 : f32 to vector<2x8x128xf32>
    %21 = arith.subf %20, %19 : vector<2x8x128xf32>
    %22 = math.exp %21 : vector<2x8x128xf32>
    %23 = math.log1p %22 : vector<2x8x128xf32>
    %24 = arith.addf %13, %23 : vector<2x8x128xf32>
    %25 = arith.select %16, %18, %24 : vector<2x8x128xi1>, vector<2x8x128xf32>
    %cst_10 = arith.constant 0.000000e+00 : f32
    %26 = vector.broadcast %cst_10 : f32 to vector<2x8x128xf32>
    %27 = arith.subf %26, %25 : vector<2x8x128xf32>
    %cst_11 = arith.constant 0.000000e+00 : f32
    %28 = vector.broadcast %cst_11 : f32 to vector<2x8x128xf32>
    %29 = arith.select %6, %27, %28 : vector<2x8x128xi1>, vector<2x8x128xf32>
    %c0_12 = arith.constant 0 : index
    %c0_13 = arith.constant 0 : index
    %c0_14 = arith.constant 0 : index
    %30 = vector.load %arg4[%c0_12, %c0_13, %c0_14] : memref<1x2x128xf32, #tpu.memory_space<vmem>>, vector<1x2x128xf32>
    %cst_15 = arith.constant dense<0.000000e+00> : vector<2x128xf32>
    %31 = vector.multi_reduction <add>, %27, %cst_15 [1] : vector<2x8x128xf32> to vector<2x128xf32>
    %32 = vector.shape_cast %31 : vector<2x128xf32> to vector<1x2x128xf32>
    %33 = arith.addf %30, %32 : vector<1x2x128xf32>
    %c0_16 = arith.constant 0 : index
    %c0_17 = arith.constant 0 : index
    %c0_18 = arith.constant 0 : index
    %34 = vector.load %arg4[%c0_16, %c0_17, %c0_18] : memref<1x2x128xf32, #tpu.memory_space<vmem>>, vector<1x2x128xf32>
    tpu.vector_store %arg4[%c0_16, %c0_17, %c0_18], %33 {strides = array<i32>} : memref<1x2x128xf32, #tpu.memory_space<vmem>>, vector<1x2x128xf32>,
    %c0_19 = arith.constant 0 : index
    %c0_20 = arith.constant 0 : index
    %c0_21 = arith.constant 0 : index
    %35 = vector.load %arg5[%c0_19, %c0_20, %c0_21] : memref<1x2x128xf32, #tpu.memory_space<vmem>>, vector<1x2x128xf32>
    %cst_22 = arith.constant dense<0.000000e+00> : vector<2x128xf32>
    %36 = vector.multi_reduction <add>, %29, %cst_22 [1] : vector<2x8x128xf32> to vector<2x128xf32>
    %37 = vector.shape_cast %36 : vector<2x128xf32> to vector<1x2x128xf32>
    %38 = arith.addf %35, %37 : vector<1x2x128xf32>
    %c0_23 = arith.constant 0 : index
    %c0_24 = arith.constant 0 : index
    %c0_25 = arith.constant 0 : index
    %39 = vector.load %arg5[%c0_23, %c0_24, %c0_25] : memref<1x2x128xf32, #tpu.memory_space<vmem>>, vector<1x2x128xf32>
    tpu.vector_store %arg5[%c0_23, %c0_24, %c0_25], %38 {strides = array<i32>} : memref<1x2x128xf32, #tpu.memory_space<vmem>>, vector<1x2x128xf32>,
    %c0_26 = arith.constant 0 : index
    %c0_27 = arith.constant 0 : index
    %c0_28 = arith.constant 0 : index
    %40 = vector.load %arg6[%c0_26, %c0_27, %c0_28] : memref<1x2x128xf32, #tpu.memory_space<vmem>>, vector<1x2x128xf32>
    %cst_29 = arith.constant dense<0.000000e+00> : vector<2x128xf32>
    %41 = vector.multi_reduction <add>, %4, %cst_29 [1] : vector<2x8x128xf32> to vector<2x128xf32>
    %42 = vector.shape_cast %41 : vector<2x128xf32> to vector<1x2x128xf32>
    %43 = arith.addf %40, %42 : vector<1x2x128xf32>
    %c0_30 = arith.constant 0 : index
    %c0_31 = arith.constant 0 : index
    %c0_32 = arith.constant 0 : index
    %44 = vector.load %arg6[%c0_30, %c0_31, %c0_32] : memref<1x2x128xf32, #tpu.memory_space<vmem>>, vector<1x2x128xf32>
    tpu.vector_store %arg6[%c0_30, %c0_31, %c0_32], %43 {strides = array<i32>} : memref<1x2x128xf32, #tpu.memory_space<vmem>>, vector<1x2x128xf32>,
    return
  }
  func.func @transform_0(%arg0: i32, %arg1: i32) -> (i32, i32, i32) {
    %c1_i32 = arith.constant 1 : i32
    %0 = arith.muli %arg0, %c1_i32 : i32
    %1 = arith.addi %0, %arg1 : i32
    %c0_i32 = arith.constant 0 : i32
    %2 = arith.minsi %1, %c0_i32 : i32
    %c0_i32_0 = arith.constant 0 : i32
    %c0_i32_1 = arith.constant 0 : i32
    %c0_i32_2 = arith.constant 0 : i32
    return %c0_i32_0, %2, %c0_i32_1 : i32, i32, i32
  }
  func.func @transform_1(%arg0: i32, %arg1: i32) -> (i32, i32, i32) {
    %c1_i32 = arith.constant 1 : i32
    %0 = arith.muli %arg0, %c1_i32 : i32
    %1 = arith.addi %0, %arg1 : i32
    %c0_i32 = arith.constant 0 : i32
    %2 = arith.minsi %1, %c0_i32 : i32
    %c0_i32_0 = arith.constant 0 : i32
    %c0_i32_1 = arith.constant 0 : i32
    %c0_i32_2 = arith.constant 0 : i32
    return %c0_i32_0, %2, %c0_i32_1 : i32, i32, i32
  }
  func.func @transform_2(%arg0: i32, %arg1: i32) -> (i32, i32, i32) {
    %c0_i32 = arith.constant 0 : i32
    %c0_i32_0 = arith.constant 0 : i32
    %c0_i32_1 = arith.constant 0 : i32
    return %arg0, %c0_i32, %c0_i32_0 : i32, i32, i32
  }
  func.func @transform_3(%arg0: i32, %arg1: i32) -> (i32, i32, i32) {
    %c0_i32 = arith.constant 0 : i32
    %c0_i32_0 = arith.constant 0 : i32
    %c0_i32_1 = arith.constant 0 : i32
    return %arg0, %c0_i32, %c0_i32_0 : i32, i32, i32
  }
  func.func @transform_4(%arg0: i32, %arg1: i32) -> (i32, i32, i32) {
    %c0_i32 = arith.constant 0 : i32
    %c0_i32_0 = arith.constant 0 : i32
    %c0_i32_1 = arith.constant 0 : i32
    return %arg0, %c0_i32, %c0_i32_0 : i32, i32, i32
  }
}

</mosaic_0001>

<bundles_post_ra>
// kernel: tpu_custom_call.1
= control target key start
LH: loop header
LB: loop body
LE: loop exit
PB: predicated region body
PF: predicated region fallthrough
CT: control target
= control target key end

     0   :  { %10 = vsyncpa [#allocation3], 0  ;;  %s486_s0 = inlined_call_operand.hbm [shape: f32[2,8,128], index: 0, kind: input, shape index: {}]   ;;  %s487_s1 = inlined_call_operand.hbm [shape: f32[2,8,128], index: 1, kind: input, shape index: {}]   ;;  %s488_s2 = inlined_call_operand.hbm [shape: f32[1,2,128], index: 2, kind: output, shape index: {0}]   ;;  %s489_s3 = inlined_call_operand.hbm [shape: f32[1,2,128], index: 3, kind: output, shape index: {1}]   ;;  %s490_s4 = inlined_call_operand.hbm [shape: f32[1,2,128], index: 4, kind: output, shape index: {2}]  }
   0x1   :  { %11 = vsyncpa [#allocation6], 0 }
   0x2   :  { %12 = vsyncpa [#allocation4], 0 }
   0x3   :  { %13 = vsyncpa [#allocation9], 0  ;;  %s358_s15 = smov [#allocation2]   ;;  %s240_s19 = scalar_lea.hbm %s486_s0, 256 }
   0x4   :  { %s24_s16 = sshll.u32 %s358_s15, 4  ;;  %p241_p0 = scmp.ne.s32.totalorder %s486_s0, %s240_s19  ;;  %s25_s16 = int_to_ptr.vmem [resolvable:$true] %s24_s16 }
   0x5   :  { %p244_p1 = scmp.lt.u32.totalorder %s240_s19, %s486_s0 }
   0x7   :  { %p246_p2 = pnand %p244_p1, %p241_p0 }
   0x9   :  { %249 = shalt.err (!%p246_p2)
}
   0xa   :  { %s250_s24 = scalar_lea.vmem %s25_s16, 256  ;;  %p255_p4 = scmp.lt.s32.totalorder %s25_s16, %s25_s16 }
   0xb   :  { %p251_p3 = scmp.ne.s32.totalorder %s25_s16, %s250_s24  ;;  %p256_p5 = scmp.lt.s32.totalorder %s250_s24, %s250_s24 }
   0xd   :  { %p257_p6 = por %p256_p5, %p255_p4 }
   0xf   :  { %p258_p7 = pnand %p257_p6, %p251_p3 }
  0x11   :  { %261 = shalt.err (!%p258_p7)
}
  0x12   :  { %s359_s25 = smov 128   ;;  %s360_s26 = smov 8  }
  0x13   :  { %30 = dma.hbm_to_vmem [thread:$0]  %s486_s0, 256, %s25_s16, [#allocation3], %s359_s25, %s359_s25, %s360_s26  }
  0x14   :  { %s361_s29 = smov [#allocation5]   ;;  %s262_s7 = scalar_lea.hbm %s487_s1, 256 }
  0x15   :  { %s41_s30 = sshll.u32 %s361_s29, 4  ;;  %p263_p8 = scmp.ne.s32.totalorder %s487_s1, %s262_s7  ;;  %s42_s30 = int_to_ptr.vmem [resolvable:$true] %s41_s30 }
  0x16   :  { %p266_p9 = scmp.lt.u32.totalorder %s262_s7, %s487_s1 }
  0x18   :  { %p268_p10 = pnand %p266_p9, %p263_p8 }
  0x1a   :  { %271 = shalt.err (!%p268_p10)
}
  0x1b   :  { %s272_s12 = scalar_lea.vmem %s42_s30, 256  ;;  %p277_p12 = scmp.lt.s32.totalorder %s42_s30, %s42_s30 }
  0x1c   :  { %p273_p11 = scmp.ne.s32.totalorder %s42_s30, %s272_s12  ;;  %p278_p13 = scmp.lt.s32.totalorder %s272_s12, %s272_s12 }
  0x1e   :  { %p279_p0 = por %p278_p13, %p277_p12 }
  0x20   :  { %p280_p1 = pnand %p279_p0, %p273_p11 }
  0x22   :  { %283 = shalt.err (!%p280_p1)
}
  0x23   :  { %47 = dma.hbm_to_vmem [thread:$0]  %s487_s1, 256, %s42_s30, [#allocation6], %s359_s25, %s359_s25, %s360_s26  }
  0x24   :  { %350 = dma.done.wait [#allocation3], 256  }
  0x25   :  { %351 = vsyncadd [#allocation3], 4294967040 }
  0x26   :  { %352 = dma.done.wait [#allocation6], 256  }
  0x27   :  { %353 = vsyncadd [#allocation6], 4294967040  ;;  %v362_v0 = vmov 0.0   ;;  %v67_v1 = vld [vmem:[#allocation2] sm:$0xff]  ;;  %v68_v2 = vld [vmem:[#allocation2 + $0x8] sm:$0xff]  ;;  %vm134_vm2 = vcmask 1041409  }
  0x28   :  { %65 = vst [vmem:[#allocation8] sm:$0x3] %v362_v0  ;;  %64 = vst [vmem:[#allocation7] sm:$0x3] %v362_v0  ;;  %v415_v3 = vld [vmem:[#allocation5] sm:$0xff]  ;;  %v417_v4 = vld [vmem:[#allocation5 + $0x8] sm:$0xff] }
  0x29   :  { %66 = vst [vmem:[#allocation10] sm:$0x3] %v362_v0  ;;  %vm71_vm0 = vcmp.gt.f32.partialorder %v415_v3, 0.0  ;;  %v73_v5 = vsub.f32 0.0, %v67_v1  ;;  %v74_v6 = vsub.f32 0.0, %v68_v2  ;;  %vm72_vm1 = vcmp.gt.f32.partialorder %v417_v4, 0.0 }
  0x2a   :  { %v159_v7 = vrot.slane %v415_v3, 4  ;;  %v165_v10 = vrot.slane %v417_v4, 4  ;;  %s363_s1 = smov [#allocation7]   ;;  %s364_s15 = smov [#allocation8]  }
  0x2b   :  { %v75_v8 = vsel %vm71_vm0, %v67_v1, %v73_v5  ;;  %v76_v9 = vsel %vm72_vm1, %v68_v2, %v74_v6  ;;  %s183_s14 = sshll.u32 %s363_s1, 4  ;;  %s193_s16 = sshll.u32 %s364_s15, 4  ;;  %s184_s14 = int_to_ptr.vmem [resolvable:$true] %s183_s14  ;;  %s436_s16 = int_to_ptr.vmem [resolvable:$true] %s193_s16 }
  0x2c   :  { %v77_v11 = vsub.f32 0.0, %v75_v8  ;;  %v78_v12 = vsub.f32 0.0, %v76_v9  ;;  %v160_v13 = vadd.f32 %v159_v7, %v415_v3  ;;  %v166_v14 = vadd.f32 %v165_v10, %v417_v4  ;;  %s365_s17 = smov [#allocation10]   ;;  %s284_s19 = scalar_lea.vmem %s184_s14, 32 }
  0x2d   :  { %s203_s18 = sshll.u32 %s365_s17, 4  ;;  %p285_p2 = scmp.ne.s32.totalorder %s184_s14, %s284_s19  ;;  %s438_s18 = int_to_ptr.vmem [resolvable:$true] %s203_s18 }
  0x2e   :  { %v85_v15 = vand.u32 2147483647, %v77_v11  ;;  %v86_v16 = vand.u32 2147483647, %v78_v12  ;;  %v161_v17 = vrot.slane %v160_v13, 2  ;;  %v167_v18 = vrot.slane %v166_v14, 2  ;;  %p289_p3 = scmp.lt.s32.totalorder %s184_s14, %s184_s14  ;;  %p290_p4 = scmp.lt.s32.totalorder %s284_s19, %s284_s19 }
  0x2f   :  { %v79_v44 = vmax.f32 %v77_v11, 0.0  ;;  %v80_v47 = vmax.f32 %v78_v12, 0.0  ;;  %vm81_vm5 = vcmp.ne.f32.partialorder %v77_v11, %v77_v11  ;;  %vm82_vm6 = vcmp.ne.f32.partialorder %v78_v12, %v78_v12 }
  0x30   :  { %v87_v19 = vsub.f32 0.0, %v85_v15  ;;  %v88_v20 = vsub.f32 0.0, %v86_v16  ;;  %v162_v21 = vadd.f32 %v161_v17, %v160_v13  ;;  %v168_v22 = vadd.f32 %v167_v18, %v166_v14  ;;  %v158_v27 = vld [vmem:[#allocation10] sm:$0x3]  ;;  %v119_v18 = vld [vmem:[#allocation7] sm:$0x3]  ;;  %p291_p5 = por %p290_p4, %p289_p3 }
  0x32   :  { %v89_v23 = vmul.f32 1.442695, %v87_v19  ;;  %v91_v24 = vmul.f32 1.442695, %v88_v20  ;;  %v163_v25 = vrot.slane %v162_v21, 1  ;;  %v169_v26 = vrot.slane %v168_v22, 1  ;;  %p292_p6 = pnand %p291_p5, %p285_p2 }
  0x33   :  { %v139_v20 = vld [vmem:[#allocation8] sm:$0x3] }
  0x34   :  { %232 = vpow2.f32 %v89_v23  ;;  %v164_v28 = vadd.f32 %v163_v25, %v162_v21  ;;  %v170_v29 = vadd.f32 %v169_v26, %v168_v22 }
  0x35   :  { %234 = vpow2.f32 %v91_v24 }
  0x36   :  { %v173_v30 = vsel %vm134_vm2, %v170_v29, %v164_v28 }
  0x37   :  { %v175_v31 = vadd.f32 %v173_v30, %v158_v27 }
  0x39   :  { %176 = vst [vmem:[#allocation10] sm:$0x3] %v175_v31 }
  0x3e   :  { %v233_v32 = vpop.eup %232 }
  0x3f   :  { %v235_v33 = vpop.eup %234  ;;  %v93_v34 = vadd.f32 1.0, %v233_v32  ;;  %v96_v36 = vmul.f32 -0.5, %v233_v32  ;;  %v99_v39 = vand.u32 2147483647, %v233_v32 }
  0x40   :  { %v102_v35 = vadd.f32 1.0, %v235_v33  ;;  %v105_v37 = vmul.f32 -0.5, %v235_v33  ;;  %v108_v41 = vand.u32 2147483647, %v235_v33 }
  0x41   :  { %236 = vlog2.f32 %v93_v34  ;;  %v97_v38 = vadd.f32 1.0, %v96_v36  ;;  %vm100_vm3 = vcmp.lt.f32.partialorder %v99_v39, 0.0004427343 }
  0x42   :  { %238 = vlog2.f32 %v102_v35  ;;  %v106_v40 = vadd.f32 1.0, %v105_v37  ;;  %vm109_vm4 = vcmp.lt.f32.partialorder %v108_v41, 0.0004427343 }
  0x43   :  { %v98_v42 = vmul.f32 %v233_v32, %v97_v38 }
  0x44   :  { %v107_v45 = vmul.f32 %v235_v33, %v106_v40 }
  0x4b   :  { %v237_v43 = vpop.eup %236 }
  0x4c   :  { %v239_v46 = vpop.eup %238  ;;  %v95_v48 = vmul.f32 0.6931472, %v237_v43 }
  0x4d   :  { %v104_v49 = vmul.f32 0.6931472, %v239_v46 }
  0x4e   :  { %v101_v50 = vsel %vm100_vm3, %v98_v42, %v95_v48 }
  0x4f   :  { %v110_v51 = vsel %vm109_vm4, %v107_v45, %v104_v49  ;;  %v111_v52 = vadd.f32 %v101_v50, %v79_v44 }
  0x50   :  { %v112_v53 = vadd.f32 %v110_v51, %v80_v47 }
  0x51   :  { %v113_v54 = vsel %vm81_vm5, %v77_v11, %v111_v52 }
  0x52   :  { %v114_v55 = vsel %vm82_vm6, %v78_v12, %v112_v53  ;;  %v115_v56 = vsub.f32 0.0, %v113_v54 }
  0x53   :  { %v116_v57 = vsub.f32 0.0, %v114_v55 }
  0x54   :  { %v117_v58 = vsel %vm71_vm0, %v115_v56, 0.0  ;;  %v120_v59 = vrot.slane %v115_v56, 4 }
  0x55   :  { %v118_v60 = vsel %vm72_vm1, %v116_v57, 0.0  ;;  %v140_v61 = vrot.slane %v117_v58, 4  ;;  %v126_v62 = vrot.slane %v116_v57, 4 }
  0x56   :  { %v146_v63 = vrot.slane %v118_v60, 4  ;;  %v121_v0 = vadd.f32 %v120_v59, %v115_v56 }
  0x57   :  { %v141_v1 = vadd.f32 %v140_v61, %v117_v58  ;;  %v127_v2 = vadd.f32 %v126_v62, %v116_v57 }
  0x58   :  { %v147_v5 = vadd.f32 %v146_v63, %v118_v60  ;;  %v122_v6 = vrot.slane %v121_v0, 2 }
  0x59   :  { %v142_v7 = vrot.slane %v141_v1, 2  ;;  %v128_v8 = vrot.slane %v127_v2, 2 }
  0x5a   :  { %v148_v9 = vrot.slane %v147_v5, 2  ;;  %v123_v10 = vadd.f32 %v122_v6, %v121_v0 }
  0x5b   :  { %v143_v11 = vadd.f32 %v142_v7, %v141_v1  ;;  %v129_v12 = vadd.f32 %v128_v8, %v127_v2 }
  0x5c   :  { %v149_v3 = vadd.f32 %v148_v9, %v147_v5  ;;  %v124_v13 = vrot.slane %v123_v10, 1 }
  0x5d   :  { %v144_v14 = vrot.slane %v143_v11, 1  ;;  %v130_v15 = vrot.slane %v129_v12, 1 }
  0x5e   :  { %v150_v4 = vrot.slane %v149_v3, 1  ;;  %v125_v16 = vadd.f32 %v124_v13, %v123_v10 }
  0x5f   :  { %v145_v17 = vadd.f32 %v144_v14, %v143_v11  ;;  %v131_v19 = vadd.f32 %v130_v15, %v129_v12 }
  0x60   :  { %v151_v21 = vadd.f32 %v150_v4, %v149_v3 }
  0x61   :  { %v135_v22 = vsel %vm134_vm2, %v131_v19, %v125_v16 }
  0x62   :  { %v154_v23 = vsel %vm134_vm2, %v151_v21, %v145_v17  ;;  %v137_v24 = vadd.f32 %v135_v22, %v119_v18 }
  0x63   :  { %v156_v25 = vadd.f32 %v154_v23, %v139_v20 }
  0x64   :  { %138 = vst [vmem:[#allocation7] sm:$0x3] %v137_v24 }
  0x65   :  { %157 = vst [vmem:[#allocation8] sm:$0x3] %v156_v25 }
  0x66   :  { %295 = shalt.err (!%p292_p6)
}
  0x67   :  { %s296_s22 = scalar_lea.hbm %s488_s2, 32 }
  0x68   :  { %p297_p7 = scmp.ne.s32.totalorder %s488_s2, %s296_s22  ;;  %p300_p8 = scmp.lt.u32.totalorder %s296_s22, %s488_s2 }
  0x6a   :  { %p302_p9 = pnand %p300_p8, %p297_p7 }
  0x6c   :  { %305 = shalt.err (!%p302_p9)
}
  0x6d   :  { %186 = dma.vmem_to_hbm [thread:$0]  %s184_s14, 32, %s488_s2, [#allocation4]  }
  0x6e   :  { %s306_s29 = scalar_lea.vmem %s436_s16, 32  ;;  %p311_p11 = scmp.lt.s32.totalorder %s436_s16, %s436_s16 }
  0x6f   :  { %p307_p10 = scmp.ne.s32.totalorder %s436_s16, %s306_s29  ;;  %p312_p12 = scmp.lt.s32.totalorder %s306_s29, %s306_s29 }
  0x71   :  { %p313_p13 = por %p312_p12, %p311_p11 }
  0x73   :  { %p314_p0 = pnand %p313_p13, %p307_p10 }
  0x75   :  { %317 = shalt.err (!%p314_p0)
}
  0x76   :  { %s318_s6 = scalar_lea.hbm %s489_s3, 32 }
  0x77   :  { %p319_p1 = scmp.ne.s32.totalorder %s489_s3, %s318_s6  ;;  %p322_p2 = scmp.lt.u32.totalorder %s318_s6, %s489_s3 }
  0x79   :  { %p324_p3 = pnand %p322_p2, %p319_p1 }
  0x7b   :  { %327 = shalt.err (!%p324_p3)
}
  0x7c   :  { %196 = dma.vmem_to_hbm [thread:$0]  %s436_s16, 32, %s489_s3, [#allocation9]  }
  0x7d   :  { %s328_s12 = scalar_lea.vmem %s438_s18, 32  ;;  %p333_p5 = scmp.lt.s32.totalorder %s438_s18, %s438_s18 }
  0x7e   :  { %p329_p4 = scmp.ne.s32.totalorder %s438_s18, %s328_s12  ;;  %p334_p6 = scmp.lt.s32.totalorder %s328_s12, %s328_s12 }
  0x80   :  { %p335_p7 = por %p334_p6, %p333_p5 }
  0x82   :  { %p336_p8 = pnand %p335_p7, %p329_p4 }
  0x84   :  { %339 = shalt.err (!%p336_p8)
}
  0x85   :  { %s340_s1 = scalar_lea.hbm %s490_s4, 32 }
  0x86   :  { %p341_p9 = scmp.ne.s32.totalorder %s490_s4, %s340_s1  ;;  %p344_p10 = scmp.lt.u32.totalorder %s340_s1, %s490_s4 }
  0x88   :  { %p346_p11 = pnand %p344_p10, %p341_p9 }
  0x8a   :  { %349 = shalt.err (!%p346_p11)
}
  0x8b   :  { %206 = dma.vmem_to_hbm [thread:$0]  %s438_s18, 32, %s490_s4, [#allocation9]  }
  0x8c   :  { %354 = dma.done.wait [#allocation4], 32  }
  0x8d   :  { %355 = vsyncadd [#allocation4], 4294967264 }
  0x8e   :  { %356 = dma.done.wait [#allocation9], 64  }
  0x8f   :  { %357 = vsyncadd [#allocation9], 4294967232 }
  0x90   :  { %216 = vsyncpa [#allocation3], 1 }
  0x91   :  { %217 = vsyncpa [#allocation6], 1 }
  0x92   :  { %218 = vsyncpa [#allocation4], 1 }
  0x93   :  { %219 = vsyncpa [#allocation9], 1 }

</bundles_post_ra>
